<compile_context>
chip_gen: v7x
topology: tpu7x:2x2x1
jax: 0.10.0
libtpu: 0.0.40
codegen_flags: <defaults>
</compile_context>

<pallas_src>
import functools
import math

import jax
import jax.numpy as jnp
import numpy as np
from jax.experimental import pallas as pl
from jax.experimental.pallas import tpu as pltpu


def _pick_tile(n, candidates):
    """Largest candidate that evenly divides n; fall back to the full extent."""
    for c in candidates:
        if c <= n and n % c == 0:
            return c
    return n


def _device_kind():
    try:
        return jax.devices()[0].device_kind.lower()
    except Exception:  # pragma: no cover - defensive; fall back to safe params
        return ""


# ---------------------------------------------------------------------------
# Stage 1: fused q/k/v projection (flattened (B*S, d_x) @ (d_x, d_*)).
# ---------------------------------------------------------------------------
def _qkv_proj_fused_kernel(x_ref, w_ref, q_ref, k_ref, v_ref, *, sm_scale,
                           d_k, compute_dtype):
    """Single MXU matmul against the concatenated (d_x, 2*d_k+d_v) weight."""
    x = x_ref[...].astype(compute_dtype)                        # (tm, d_x)
    qkv = jnp.dot(x, w_ref[...], preferred_element_type=jnp.float32)
    q = qkv[:, :d_k]                                            # 128-aligned
    k = qkv[:, d_k:2 * d_k]
    v = qkv[:, 2 * d_k:]
    if sm_scale != 1.0:
        q = q * sm_scale            # fold softmax scale: O(M*d_k), not O(S^2)
    q_ref[...] = q.astype(q_ref.dtype)
    k_ref[...] = k.astype(k_ref.dtype)
    v_ref[...] = v.astype(v_ref.dtype)


def _qkv_proj_split_kernel(x_ref, wq_ref, wk_ref, wv_ref, q_ref, k_ref, v_ref,
                           *, sm_scale, compute_dtype):
    """Three matmuls; used when d_k/d_v are not 128-lane aligned."""
    x = x_ref[...].astype(compute_dtype)                        # (tm, d_x)
    q = jnp.dot(x, wq_ref[...], preferred_element_type=jnp.float32)
    k = jnp.dot(x, wk_ref[...], preferred_element_type=jnp.float32)
    v = jnp.dot(x, wv_ref[...], preferred_element_type=jnp.float32)
    if sm_scale != 1.0:
        q = q * sm_scale
    q_ref[...] = q.astype(q_ref.dtype)
    k_ref[...] = k.astype(k_ref.dtype)
    v_ref[...] = v.astype(v_ref.dtype)


# ---------------------------------------------------------------------------
# Stage 2: flash attention with online softmax over KV tiles.
# ---------------------------------------------------------------------------
def _flash_attn_kernel(q_ref, k_ref, v_ref, o_ref, m_sc, l_sc, acc_sc, *,
                       is_causal, tq, tk, exp_dtype):
    qi = pl.program_id(1)
    ki = pl.program_id(2)

    @pl.when(ki == 0)
    def _init():
        m_sc[...] = jnp.full(m_sc.shape, -jnp.inf, dtype=m_sc.dtype)
        l_sc[...] = jnp.zeros(l_sc.shape, dtype=l_sc.dtype)
        acc_sc[...] = jnp.zeros(acc_sc.shape, dtype=acc_sc.dtype)

    def _step(apply_mask):
        q = q_ref[0]                                  # (tq, d_k), pre-scaled
        k = k_ref[0]                                  # (tk, d_k)
        v = v_ref[0]                                  # (tk, d_v)
        # Q @ K^T as a feature-axis contraction -> no in-kernel transpose.
        s = jax.lax.dot_general(q, k, (((1,), (1,)), ((), ())),
                                preferred_element_type=jnp.float32)
        if apply_mask:
            row = qi * tq + jax.lax.broadcasted_iota(jnp.int32, (tq, tk), 0)
            col = ki * tk + jax.lax.broadcasted_iota(jnp.int32, (tq, tk), 1)
            s = jnp.where(col <= row, s, -jnp.inf)
        m_prev = m_sc[...]
        m_new = jnp.maximum(m_prev, jnp.max(s, axis=-1, keepdims=True))
        alpha = jnp.exp(m_prev - m_new)               # f32, (tq, 1)
        p = jnp.exp((s - m_new).astype(exp_dtype))    # bf16 exp on v6e/v7x
        l_sc[...] = alpha * l_sc[...] + jnp.sum(
            p.astype(jnp.float32), axis=-1, keepdims=True)
        acc_sc[...] = alpha * acc_sc[...] + jnp.dot(
            p.astype(v.dtype), v, preferred_element_type=jnp.float32)
        m_sc[...] = m_new

    if is_causal:
        q_first = qi * tq
        q_last = qi * tq + (tq - 1)
        k_first = ki * tk
        k_last = ki * tk + (tk - 1)
        overlap = k_first <= q_last        # tile has >= 1 unmasked entry
        crosses_diag = k_last > q_first    # tile actually needs masking
        # Diagonal tiles: masked path.  Interior tiles: no-mask fast path.
        pl.when(jnp.logical_and(overlap, crosses_diag))(lambda: _step(True))
        pl.when(jnp.logical_and(overlap, jnp.logical_not(crosses_diag)))(
            lambda: _step(False))
        # Fully-masked tiles: no compute (and no DMA - clamped kv index_map).
    else:
        _step(False)

    @pl.when(ki == pl.num_programs(2) - 1)
    def _finalize():
        inv_l = pl.reciprocal(l_sc[...], approx=True)           # EUP slot
        o_ref[0] = (acc_sc[...] * inv_l).astype(o_ref.dtype)


# ---------------------------------------------------------------------------
# Wrapper
# ---------------------------------------------------------------------------
def self_attention(x, wq, wk, wv, *, scale=True, attn_mask=None,
                   is_causal=False, compute_dtype=jnp.bfloat16,
                   tq=None, tk=None):
    """Pallas self-attention matching PyTorch SelfAttention.forward.

    x:  (B, S, d_x) or (S, d_x)
    wq: (d_k, d_x), wk: (d_k, d_x), wv: (d_v, d_x)   (nn.Linear layout)
    compute_dtype: dtype of the MXU operands and q/k/v intermediates.  Default
        bf16 (full-rate MXU, half the HBM traffic; note this quantizes the
        operands).  Pass jnp.float32 (or None = x.dtype) for an exact path.
        Accumulation and softmax state are always f32; output keeps x's dtype.
    Returns (B, S, d_v) (or (1, S, d_v) for 2-D x, mirroring unsqueeze(0)).
    """
    if attn_mask is not None:
        # TODO(synk): arbitrary float/bool attn_mask not plumbed into kernel.
        raise NotImplementedError("attn_mask is not supported; use is_causal.")
    if x.ndim == 2:
        x = x[None, ...]
    elif x.ndim != 3:
        raise ValueError(f"Invalid number of tensor dimensions: {x.ndim}")

    B, S, d_x = x.shape
    d_k, d_v = wq.shape[0], wv.shape[0]
    sm_scale = (1.0 / math.sqrt(d_k)) if scale else 1.0
    out_dtype = x.dtype
    if compute_dtype is None:
        compute_dtype = x.dtype
    compute_dtype = np.dtype(compute_dtype)

    kind = _device_kind()
    newer_gen = ("v6" in kind) or ("v7" in kind)     # v6e / v7x

    # ---- Stage 1: q/k/v projection over the flattened (B*S, d_x) matrix ----
    M = B * S
    x2d = x.reshape(M, d_x)
    tm = _pick_tile(M, (512, 256, 128, 64, 32, 16, 8))
    proj_out_shape = (
        jax.ShapeDtypeStruct((M, d_k), compute_dtype),
        jax.ShapeDtypeStruct((M, d_k), compute_dtype),
        jax.ShapeDtypeStruct((M, d_v), compute_dtype),
    )
    proj_out_specs = [
        pl.BlockSpec((tm, d_k), lambda i: (i, 0)),
        pl.BlockSpec((tm, d_k), lambda i: (i, 0)),
        pl.BlockSpec((tm, d_v), lambda i: (i, 0)),
    ]
    if d_k % 128 == 0 and d_v % 128 == 0:
        # Lane-aligned head dims: one MXU RHS push for all three projections.
        w_cat = jnp.concatenate([wq, wk, wv], axis=0).T.astype(compute_dtype)
        q2d, k2d, v2d = pl.pallas_call(
            functools.partial(_qkv_proj_fused_kernel, sm_scale=sm_scale,
                              d_k=d_k, compute_dtype=compute_dtype),
            out_shape=proj_out_shape,
            grid_spec=pltpu.PrefetchScalarGridSpec(
                num_scalar_prefetch=0,
                grid=(M // tm,),
                in_specs=[
                    pl.BlockSpec((tm, d_x), lambda i: (i, 0)),
                    pl.BlockSpec((d_x, 2 * d_k + d_v), lambda i: (0, 0)),
                ],
                out_specs=proj_out_specs,
            ),
            compiler_params=pltpu.CompilerParams(
                dimension_semantics=("parallel",)),
        )(x2d, w_cat)
    else:
        wqt = wq.T.astype(compute_dtype)
        wkt = wk.T.astype(compute_dtype)
        wvt = wv.T.astype(compute_dtype)
        q2d, k2d, v2d = pl.pallas_call(
            functools.partial(_qkv_proj_split_kernel, sm_scale=sm_scale,
                              compute_dtype=compute_dtype),
            out_shape=proj_out_shape,
            grid_spec=pltpu.PrefetchScalarGridSpec(
                num_scalar_prefetch=0,
                grid=(M // tm,),
                in_specs=[
                    pl.BlockSpec((tm, d_x), lambda i: (i, 0)),
                    pl.BlockSpec((d_x, d_k), lambda i: (0, 0)),
                    pl.BlockSpec((d_x, d_k), lambda i: (0, 0)),
                    pl.BlockSpec((d_x, d_v), lambda i: (0, 0)),
                ],
                out_specs=proj_out_specs,
            ),
            compiler_params=pltpu.CompilerParams(
                dimension_semantics=("parallel",)),
        )(x2d, wqt, wkt, wvt)
    q = q2d.reshape(B, S, d_k)
    k = k2d.reshape(B, S, d_k)
    v = v2d.reshape(B, S, d_v)

    # ---- Stage 2: flash attention, grid (B, q-blocks, kv-blocks) -----------
    # Working set at tq=tk=512, d=128 bf16 is only a few MiB (double-buffered
    # q/k/v/o tiles + f32 scores + f32 accumulator), comfortably under the
    # default scoped-VMEM limit on every generation (incl. v7x's 64 MiB).
    max_tile = 512 if newer_gen else 256             # v5e: keep tiles modest
    cands = tuple(t for t in (512, 256, 128, 64, 32, 16, 8) if t <= max_tile)
    if tq is None:
        tq = _pick_tile(S, cands)
    if tk is None:
        tk = _pick_tile(S, cands)
    if S % tq != 0 or S % tk != 0:
        raise ValueError(f"tq={tq} / tk={tk} must divide S={S}")

    # bf16 exp on v6e/v7x (bf16 EUP ~2x f32 rate); v5e has no bf16 EUP/VPU.
    exp_dtype = (jnp.bfloat16
                 if (newer_gen and compute_dtype == np.dtype(jnp.bfloat16))
                 else jnp.float32)

    if is_causal:
        # Clamp the KV block index for fully-masked grid steps so the block
        # index repeats and Pallas elides the K/V DMA (pl.when only skips
        # compute, not the BlockSpec copy).
        def kv_index_map(b, i, j):
            last_needed = (i * tq + tq - 1) // tk
            return (b, jnp.minimum(j, last_needed), 0)
    else:
        def kv_index_map(b, i, j):
            return (b, j, 0)

    out = pl.pallas_call(
        functools.partial(_flash_attn_kernel, is_causal=is_causal,
                          tq=tq, tk=tk, exp_dtype=exp_dtype),
        out_shape=jax.ShapeDtypeStruct((B, S, d_v), out_dtype),
        grid_spec=pltpu.PrefetchScalarGridSpec(
            num_scalar_prefetch=0,
            grid=(B, S // tq, S // tk),
            in_specs=[
                pl.BlockSpec((1, tq, d_k), lambda b, i, j: (b, i, 0)),
                pl.BlockSpec((1, tk, d_k), kv_index_map),
                pl.BlockSpec((1, tk, d_v), kv_index_map),
            ],
            out_specs=pl.BlockSpec((1, tq, d_v), lambda b, i, j: (b, i, 0)),
            scratch_shapes=[
                pltpu.VMEM((tq, 1), jnp.float32),     # running max m
                pltpu.VMEM((tq, 1), jnp.float32),     # running denom l
                pltpu.VMEM((tq, d_v), jnp.float32),   # output accumulator
            ],
        ),
        compiler_params=pltpu.CompilerParams(
            dimension_semantics=("parallel", "parallel", "arbitrary")),
    )(q, k, v)
    return out


# ---------------------------------------------------------------------------
# Pure-JAX reference for correctness checking.
# ---------------------------------------------------------------------------
def _reference(x, wq, wk, wv, *, scale=True, is_causal=False):
    if x.ndim == 2:
        x = x[None, ...]
    q = jnp.einsum("bsx,kx->bsk", x, wq)
    k = jnp.einsum("bsx,kx->bsk", x, wk)
    v = jnp.einsum("bsx,vx->bsv", x, wv)
    sm_scale = (1.0 / math.sqrt(wq.shape[0])) if scale else 1.0
    scores = jnp.einsum("bqd,bkd->bqk", q, k) * sm_scale
    if is_causal:
        s = scores.shape[-1]
        row = jnp.arange(s)[:, None]
        col = jnp.arange(s)[None, :]
        scores = jnp.where(col <= row, scores, -jnp.inf)
    probs = jax.nn.softmax(scores, axis=-1)
    return jnp.einsum("bqk,bkv->bqv", probs, v)


if __name__ == "__main__":
    key = jax.random.PRNGKey(0)
    kx, kq, kk, kv_ = jax.random.split(key, 4)

    def _quant_bf16(*arrs):
        return tuple(a.astype(jnp.bfloat16).astype(jnp.float32) for a in arrs)

    # ---- test 1: 128-lane aligned dims (fused 1-matmul projection),
    #              default bf16 path, non-causal ----------------------------
    B, S, D = 2, 128, 128
    bound = 1.0 / math.sqrt(D)
    x = jax.random.normal(kx, (B, S, D), dtype=jnp.float32)
    wq = jax.random.uniform(kq, (D, D), jnp.float32, -bound, bound)
    wk = jax.random.uniform(kk, (D, D), jnp.float32, -bound, bound)
    wv = jax.random.uniform(kv_, (D, D), jnp.float32, -bound, bound)
    xb, wqb, wkb, wvb = _quant_bf16(x, wq, wk, wv)

    out = jax.block_until_ready(self_attention(x, wq, wk, wv))
    ref = _reference(xb, wqb, wkb, wvb)
    assert out.shape == (B, S, D) and out.dtype == jnp.float32
    assert float(jnp.max(jnp.abs(out - ref))) < 5e-2, "bf16 non-causal mismatch"

    # ---- test 2: exact f32 path, non-causal --------------------------------
    out_f32 = jax.block_until_ready(
        self_attention(x, wq, wk, wv, compute_dtype=jnp.float32))
    ref_f32 = _reference(x, wq, wk, wv)
    assert float(jnp.max(jnp.abs(out_f32 - ref_f32))) < 1e-2, "f32 mismatch"

    # ---- test 3: causal, non-aligned head dim (split projection path),
    #              forced multi-tile grid -> exercises the clamped K/V DMA
    #              index_map, the interior no-mask fast path and tile skip ---
    B3, S3, D3 = 2, 256, 64
    bound3 = 1.0 / math.sqrt(D3)
    x3 = jax.random.normal(kx, (B3, S3, D3), dtype=jnp.float32)
    wq3 = jax.random.uniform(kq, (D3, D3), jnp.float32, -bound3, bound3)
    wk3 = jax.random.uniform(kk, (D3, D3), jnp.float32, -bound3, bound3)
    wv3 = jax.random.uniform(kv_, (D3, D3), jnp.float32, -bound3, bound3)
    x3b, wq3b, wk3b, wv3b = _quant_bf16(x3, wq3, wk3, wv3)

    out_c = jax.block_until_ready(
        self_attention(x3, wq3, wk3, wv3, is_causal=True, tq=64, tk=64))
    ref_c = _reference(x3b, wq3b, wk3b, wv3b, is_causal=True)
    assert out_c.shape == (B3, S3, D3)
    assert float(jnp.max(jnp.abs(out_c - ref_c))) < 5e-2, "causal mismatch"

    # ---- test 4: tiny, unaligned 2-D input (mirrors x.unsqueeze(0)) --------
    S4, D4 = 8, 32
    bound4 = 1.0 / math.sqrt(D4)
    x4 = jax.random.normal(kx, (S4, D4), dtype=jnp.float32)
    wq4 = jax.random.uniform(kq, (D4, D4), jnp.float32, -bound4, bound4)
    wk4 = jax.random.uniform(kk, (D4, D4), jnp.float32, -bound4, bound4)
    wv4 = jax.random.uniform(kv_, (D4, D4), jnp.float32, -bound4, bound4)
    x4b, wq4b, wk4b, wv4b = _quant_bf16(x4, wq4, wk4, wv4)

    out4 = jax.block_until_ready(
        self_attention(x4, wq4, wk4, wv4, is_causal=True))
    ref4 = _reference(x4b, wq4b, wk4b, wv4b, is_causal=True)
    assert out4.shape == (1, S4, D4)
    assert float(jnp.max(jnp.abs(out4 - ref4))) < 5e-2, "tiny-shape mismatch"

    print("KERNEL_OK")
</pallas_src>

<mosaic_0001>
module attributes {stable_mosaic.version = 11 : i64} {
  func.func @_qkv_proj_fused_kernel(%arg0: i32, %arg1: memref<256x128xf32, #tpu.memory_space<vmem>>, %arg2: memref<128x384xbf16, #tpu.memory_space<vmem>>, %arg3: memref<256x128xbf16, #tpu.memory_space<vmem>>, %arg4: memref<256x128xbf16, #tpu.memory_space<vmem>>, %arg5: memref<256x128xbf16, #tpu.memory_space<vmem>>) attributes {dimension_semantics = [#tpu.dimension_semantics<parallel>], iteration_bounds = array<i64: 1>, scalar_prefetch = 0 : i64, scratch_operands = 0 : i64, tpu.core_type = #tpu.core_type<tc>, window_params = [{transform_indices = @transform_0, window_bounds = array<i64: 256, 128>}, {pipeline_mode = #tpu.pipeline_mode<synchronous>, transform_indices = @transform_1, window_bounds = array<i64: 128, 384>}, {transform_indices = @transform_2, window_bounds = array<i64: 256, 128>}, {transform_indices = @transform_3, window_bounds = array<i64: 256, 128>}, {transform_indices = @transform_4, window_bounds = array<i64: 256, 128>}]} {
    %c0 = arith.constant 0 : index
    %c0_0 = arith.constant 0 : index
    %0 = vector.load %arg1[%c0, %c0_0] : memref<256x128xf32, #tpu.memory_space<vmem>>, vector<256x128xf32>
    %1 = arith.truncf %0 : vector<256x128xf32> to vector<256x128xbf16>
    %c0_1 = arith.constant 0 : index
    %c0_2 = arith.constant 0 : index
    %2 = vector.load %arg2[%c0_1, %c0_2] : memref<128x384xbf16, #tpu.memory_space<vmem>>, vector<128x384xbf16>
    %cst = arith.constant dense<0.000000e+00> : vector<256x384xf32>
    %3 = tpu.matmul %1, %2, %cst {dimension_numbers = #tpu.dot_dimension_numbers<[1], [0], [0], [1], [0, 0, 1, 1], [], []>} : vector<256x128xbf16>, vector<128x384xbf16>, vector<256x384xf32> -> vector<256x384xf32>
    %4 = vector.extract_strided_slice %3 {offsets = [0, 0], sizes = [256, 128], strides = [1, 1]} : vector<256x384xf32> to vector<256x128xf32>
    %5 = vector.extract_strided_slice %3 {offsets = [0, 128], sizes = [256, 128], strides = [1, 1]} : vector<256x384xf32> to vector<256x128xf32>
    %6 = vector.extract_strided_slice %3 {offsets = [0, 256], sizes = [256, 128], strides = [1, 1]} : vector<256x384xf32> to vector<256x128xf32>
    %cst_3 = arith.constant 0.0883883461 : f32
    %7 = vector.broadcast %cst_3 : f32 to vector<256x128xf32>
    %8 = arith.mulf %4, %7 : vector<256x128xf32>
    %9 = arith.truncf %8 : vector<256x128xf32> to vector<256x128xbf16>
    %c0_4 = arith.constant 0 : index
    %c0_5 = arith.constant 0 : index
    %10 = vector.load %arg3[%c0_4, %c0_5] : memref<256x128xbf16, #tpu.memory_space<vmem>>, vector<256x128xbf16>
    tpu.vector_store %arg3[%c0_4, %c0_5], %9 {strides = array<i32>} : memref<256x128xbf16, #tpu.memory_space<vmem>>, vector<256x128xbf16>,
    %11 = arith.truncf %5 : vector<256x128xf32> to vector<256x128xbf16>
    %c0_6 = arith.constant 0 : index
    %c0_7 = arith.constant 0 : index
    %12 = vector.load %arg4[%c0_6, %c0_7] : memref<256x128xbf16, #tpu.memory_space<vmem>>, vector<256x128xbf16>
    tpu.vector_store %arg4[%c0_6, %c0_7], %11 {strides = array<i32>} : memref<256x128xbf16, #tpu.memory_space<vmem>>, vector<256x128xbf16>,
    %13 = arith.truncf %6 : vector<256x128xf32> to vector<256x128xbf16>
    %c0_8 = arith.constant 0 : index
    %c0_9 = arith.constant 0 : index
    %14 = vector.load %arg5[%c0_8, %c0_9] : memref<256x128xbf16, #tpu.memory_space<vmem>>, vector<256x128xbf16>
    tpu.vector_store %arg5[%c0_8, %c0_9], %13 {strides = array<i32>} : memref<256x128xbf16, #tpu.memory_space<vmem>>, vector<256x128xbf16>,
    return
  }
  func.func @transform_0(%arg0: i32) -> (i32, i32) {
    %c0_i32 = arith.constant 0 : i32
    %c0_i32_0 = arith.constant 0 : i32
    return %arg0, %c0_i32 : i32, i32
  }
  func.func @transform_1(%arg0: i32) -> (i32, i32) {
    %c0_i32 = arith.constant 0 : i32
    %c0_i32_0 = arith.constant 0 : i32
    %c0_i32_1 = arith.constant 0 : i32
    return %c0_i32, %c0_i32_0 : i32, i32
  }
  func.func @transform_2(%arg0: i32) -> (i32, i32) {
    %c0_i32 = arith.constant 0 : i32
    %c0_i32_0 = arith.constant 0 : i32
    return %arg0, %c0_i32 : i32, i32
  }
  func.func @transform_3(%arg0: i32) -> (i32, i32) {
    %c0_i32 = arith.constant 0 : i32
    %c0_i32_0 = arith.constant 0 : i32
    return %arg0, %c0_i32 : i32, i32
  }
  func.func @transform_4(%arg0: i32) -> (i32, i32) {
    %c0_i32 = arith.constant 0 : i32
    %c0_i32_0 = arith.constant 0 : i32
    return %arg0, %c0_i32 : i32, i32
  }
}

</mosaic_0001>

<bundles_post_ra>
// kernel: tpu_custom_call.1
= control target key start
LH: loop header
LB: loop body
LE: loop exit
PB: predicated region body
PF: predicated region fallthrough
CT: control target
= control target key end

     0   :  { %10 = vsyncpa [#allocation3], 0  ;;  %s2071_s0 = inlined_call_operand.hbm [shape: f32[256,128], index: 0, kind: input, shape index: {}]   ;;  %s2072_s1 = inlined_call_operand.hbm [shape: bf16[128,384], index: 1, kind: input, shape index: {}]   ;;  %s2073_s2 = inlined_call_operand.hbm [shape: bf16[256,128], index: 2, kind: output, shape index: {0}]   ;;  %s2074_s3 = inlined_call_operand.hbm [shape: bf16[256,128], index: 3, kind: output, shape index: {1}]   ;;  %s2075_s4 = inlined_call_operand.hbm [shape: bf16[256,128], index: 4, kind: output, shape index: {2}]  }
   0x1   :  { %11 = vsyncpa [#allocation6], 0 }
   0x2   :  { %12 = vsyncpa [#allocation4], 0 }
   0x3   :  { %13 = vsyncpa [#allocation9], 0  ;;  %s1919_s15 = smov [#allocation2]   ;;  %s1801_s19 = scalar_lea.hbm %s2071_s0, 4096 }
   0x4   :  { %s19_s16 = sshll.u32 %s1919_s15, 4  ;;  %p1802_p0 = scmp.ne.s32.totalorder %s2071_s0, %s1801_s19  ;;  %s20_s16 = int_to_ptr.vmem [resolvable:$true] %s19_s16 }
   0x5   :  { %p1805_p1 = scmp.lt.u32.totalorder %s1801_s19, %s2071_s0 }
   0x7   :  { %p1807_p2 = pnand %p1805_p1, %p1802_p0 }
   0x9   :  { %1810 = shalt.err (!%p1807_p2)
}
   0xa   :  { %s1811_s24 = scalar_lea.vmem %s20_s16, 4096  ;;  %p1816_p4 = scmp.lt.s32.totalorder %s20_s16, %s20_s16 }
   0xb   :  { %p1812_p3 = scmp.ne.s32.totalorder %s20_s16, %s1811_s24  ;;  %p1817_p5 = scmp.lt.s32.totalorder %s1811_s24, %s1811_s24 }
   0xd   :  { %p1818_p6 = por %p1817_p5, %p1816_p4 }
   0xf   :  { %p1819_p7 = pnand %p1818_p6, %p1812_p3 }
  0x11   :  { %1822 = shalt.err (!%p1819_p7)
}
  0x12   :  { %s1920_s25 = smov 128   ;;  %s1921_s26 = smov 8  }
  0x13   :  { %25 = dma.hbm_to_vmem [thread:$0]  %s2071_s0, 4096, %s20_s16, [#allocation3], %s1920_s25, %s1920_s25, %s1921_s26  }
  0x14   :  { %s1922_s29 = smov [#allocation5]   ;;  %s1823_s7 = scalar_lea.hbm %s2072_s1, 3072 }
  0x15   :  { %s31_s30 = sshll.u32 %s1922_s29, 4  ;;  %p1824_p8 = scmp.ne.s32.totalorder %s2072_s1, %s1823_s7  ;;  %s32_s30 = int_to_ptr.vmem [resolvable:$true] %s31_s30 }
  0x16   :  { %p1827_p9 = scmp.lt.u32.totalorder %s1823_s7, %s2072_s1 }
  0x18   :  { %p1829_p10 = pnand %p1827_p9, %p1824_p8 }
  0x1a   :  { %1832 = shalt.err (!%p1829_p10)
}
  0x1b   :  { %s1833_s12 = scalar_lea.vmem %s32_s30, 3072  ;;  %p1838_p12 = scmp.lt.s32.totalorder %s32_s30, %s32_s30 }
  0x1c   :  { %p1834_p11 = scmp.ne.s32.totalorder %s32_s30, %s1833_s12  ;;  %p1839_p13 = scmp.lt.s32.totalorder %s1833_s12, %s1833_s12 }
  0x1e   :  { %p1840_p0 = por %p1839_p13, %p1838_p12 }
  0x20   :  { %p1841_p1 = pnand %p1840_p0, %p1834_p11 }
  0x22   :  { %1844 = shalt.err (!%p1841_p1)
}
  0x23   :  { %s1923_s0 = smov 192   ;;  %s1924_s13 = smov 12  }
  0x24   :  { %37 = dma.hbm_to_vmem [thread:$0]  %s2072_s1, 3072, %s32_s30, [#allocation6], %s1923_s0, %s1923_s0, %s1924_s13  }
  0x25   :  { %1911 = dma.done.wait [#allocation3], 4096  }
  0x26   :  { %1912 = vsyncadd [#allocation3], 4294963200 }
  0x27   :  { %1913 = dma.done.wait [#allocation6], 3072  }
  0x28   :  { %1914 = vsyncadd [#allocation6], 4294964224  ;;  %v1925_v0 = vmov 0   ;;  %v1769_v1 = vld [vmem:[#allocation5 + $0x4] ss:$12 sps:$4 sm:$0xff]   ;;  %v46_v18 = vld [vmem:[#allocation2 + $0x8] sm:$0xff] }
  0x29   :  { %285 = vmatprep.mubr.bf16.mxu0 %v1925_v0  ;;  %405 = vmatprep.mubr.bf16.mxu1 %v1925_v0  ;;  %v1771_v2 = vld [vmem:[#allocation5] ss:$12 sps:$4 sm:$0xff]   ;;  %v1772_v3 = vld [vmem:[#allocation5 + $0x1c] ss:$12 sps:$4 sm:$0xff]   ;;  %v1774_v4 = vld [vmem:[#allocation5 + $0x18] ss:$12 sps:$4 sm:$0xff]  }
  0x2a   :  { %253 = vmatprep.subr.bf16.mxu0 %v1769_v1  ;;  %1741 = vmatprep.subr.bf16.mxu1 %v1769_v1  ;;  %v1775_v5 = vld [vmem:[#allocation5 + $0x34] ss:$12 sps:$4 sm:$0xff]   ;;  %v1777_v6 = vld [vmem:[#allocation5 + $0x30] ss:$12 sps:$4 sm:$0xff]   ;;  %v1778_v7 = vld [vmem:[#allocation5 + $0x4c] ss:$12 sps:$4 sm:$0xff]  }
  0x2b   :  { %254 = vmatpush1.bf16.msra.mxu0 %v1771_v2  ;;  %1749 = vmatpush1.bf16.msra.mxu1 %v1771_v2  ;;  %v1780_v8 = vld [vmem:[#allocation5 + $0x48] ss:$12 sps:$4 sm:$0xff]   ;;  %v1781_v9 = vld [vmem:[#allocation5 + $0x64] ss:$12 sps:$4 sm:$0xff]   ;;  %v1783_v10 = vld [vmem:[#allocation5 + $0x60] ss:$12 sps:$4 sm:$0xff]  }
  0x2c   :  { %255 = vmatprep.subr.bf16.mxu0 %v1772_v3  ;;  %1742 = vmatprep.subr.bf16.mxu1 %v1772_v3  ;;  %v1784_v11 = vld [vmem:[#allocation5 + $0x7c] ss:$12 sps:$4 sm:$0xff]   ;;  %v1786_v12 = vld [vmem:[#allocation5 + $0x78] ss:$12 sps:$4 sm:$0xff]   ;;  %v1787_v13 = vld [vmem:[#allocation5 + $0x94] ss:$12 sps:$4 sm:$0xff]  }
  0x2d   :  { %v1789_v14 = vld [vmem:[#allocation5 + $0x90] ss:$12 sps:$4 sm:$0xff]   ;;  %v1790_v15 = vld [vmem:[#allocation5 + $0xac] ss:$12 sps:$4 sm:$0xff]   ;;  %v1792_v16 = vld [vmem:[#allocation5 + $0xa8] ss:$12 sps:$4 sm:$0xff]  }
  0x2e   :  { %v45_v17 = vld [vmem:[#allocation2] sm:$0xff]  ;;  %v70_v20 = vld [vmem:[#allocation2 + $0xc8] sm:$0xff]  ;;  %v47_v25 = vld [vmem:[#allocation2 + $0x10] sm:$0xff]  ;;  %s1926_s1 = smov [#allocation8]   ;;  %s1927_s17 = smov [#allocation7]  }
  0x2f   :  { %256 = vmatpush1.bf16.msra.mxu0 %v1774_v4  ;;  %1750 = vmatpush1.bf16.msra.mxu1 %v1774_v4  ;;  %v69_v19 = vld [vmem:[#allocation2 + $0xc0] sm:$0xff]  ;;  %v1793_v21 = vld [vmem:[#allocation5 + $0x8] ss:$12 sps:$4 sm:$0xff]   ;;  %v77_v22 = vpack.c.bf16 %v46_v18, %v45_v17  ;;  %v48_v26 = vld [vmem:[#allocation2 + $0x18] sm:$0xff]  ;;  %s1136_s16 = sshll.u32 %s1926_s1, 4  ;;  %s1124_s18 = sshll.u32 %s1927_s17, 4  ;;  %s1137_s16 = int_to_ptr.vmem [resolvable:$true] %s1136_s16  ;;  %s2012_s18 = int_to_ptr.vmem [resolvable:$true] %s1124_s18 }
  0x30   :  { %257 = vmatprep.subr.bf16.mxu0 %v1775_v5  ;;  %1743 = vmatprep.subr.bf16.mxu1 %v1775_v5  ;;  %v1982_v23 = vpack.c.bf16 %v70_v20, %v69_v19  ;;  %v1794_v24 = vld [vmem:[#allocation5 + $0x20] ss:$12 sps:$4 sm:$0xff]   ;;  %v71_v27 = vld [vmem:[#allocation2 + $0xd0] sm:$0xff]  ;;  %v72_v28 = vld [vmem:[#allocation2 + $0xd8] sm:$0xff]  ;;  %v78_v30 = vpack.c.bf16 %v48_v26, %v47_v25  ;;  %s1928_s19 = smov [#allocation10]   ;;  %s1845_s21 = scalar_lea.vmem %s1137_s16, 2048 }
  0x31   :  { %v1795_v29 = vld [vmem:[#allocation5 + $0x38] ss:$12 sps:$4 sm:$0xff]   ;;  %v1987_v31 = vpack.c.bf16 %v72_v28, %v71_v27  ;;  %v1796_v32 = vld [vmem:[#allocation5 + $0x50] ss:$12 sps:$4 sm:$0xff]   ;;  %v50_v34 = vld [vmem:[#allocation2 + $0x28] sm:$0xff]  ;;  %s1148_s20 = sshll.u32 %s1928_s19, 4  ;;  %p1846_p2 = scmp.ne.s32.totalorder %s1137_s16, %s1845_s21  ;;  %s2014_s20 = int_to_ptr.vmem [resolvable:$true] %s1148_s20 }
  0x32   :  { %v49_v33 = vld [vmem:[#allocation2 + $0x20] sm:$0xff]  ;;  %v74_v36 = vld [vmem:[#allocation2 + $0xe8] sm:$0xff]  ;;  %v51_v41 = vld [vmem:[#allocation2 + $0x30] sm:$0xff]  ;;  %p1850_p3 = scmp.lt.s32.totalorder %s1137_s16, %s1137_s16  ;;  %p1851_p4 = scmp.lt.s32.totalorder %s1845_s21, %s1845_s21 }
  0x33   :  { %258 = vmatpush1.bf16.msra.mxu0 %v1777_v6  ;;  %1751 = vmatpush1.bf16.msra.mxu1 %v1777_v6  ;;  %v73_v35 = vld [vmem:[#allocation2 + $0xe0] sm:$0xff]  ;;  %v1797_v37 = vld [vmem:[#allocation5 + $0x68] ss:$12 sps:$4 sm:$0xff]   ;;  %v79_v38 = vpack.c.bf16 %v50_v34, %v49_v33  ;;  %v52_v42 = vld [vmem:[#allocation2 + $0x38] sm:$0xff] }
  0x34   :  { %259 = vmatprep.subr.bf16.mxu0 %v1778_v7  ;;  %1744 = vmatprep.subr.bf16.mxu1 %v1778_v7  ;;  %v1992_v39 = vpack.c.bf16 %v74_v36, %v73_v35  ;;  %v1798_v40 = vld [vmem:[#allocation5 + $0x80] ss:$12 sps:$4 sm:$0xff]   ;;  %v75_v43 = vld [vmem:[#allocation2 + $0xf0] sm:$0xff]  ;;  %v76_v44 = vld [vmem:[#allocation2 + $0xf8] sm:$0xff]  ;;  %v80_v46 = vpack.c.bf16 %v52_v42, %v51_v41  ;;  %p1852_p5 = por %p1851_p4, %p1850_p3 }
  0x35   :  { %v1799_v45 = vld [vmem:[#allocation5 + $0x98] ss:$12 sps:$4 sm:$0xff]   ;;  %v1997_v47 = vpack.c.bf16 %v76_v44, %v75_v43  ;;  %v1800_v48 = vld [vmem:[#allocation5 + $0xb0] ss:$12 sps:$4 sm:$0xff]   ;;  %v54_v50 = vld [vmem:[#allocation2 + $0x48] sm:$0xff] }
  0x36   :  { %v53_v49 = vld [vmem:[#allocation2 + $0x40] sm:$0xff]  ;;  %v55_v52 = vld [vmem:[#allocation2 + $0x50] sm:$0xff]  ;;  %v56_v53 = vld [vmem:[#allocation2 + $0x58] sm:$0xff]  ;;  %p1853_p6 = pnand %p1852_p5, %p1846_p2 }
  0x37   :  { %260 = vmatpush1.bf16.msra.mxu0 %v1780_v8  ;;  %1752 = vmatpush1.bf16.msra.mxu1 %v1780_v8  ;;  %v81_v51 = vpack.c.bf16 %v54_v50, %v53_v49  ;;  %v82_v54 = vpack.c.bf16 %v56_v53, %v55_v52  ;;  %v57_v55 = vld [vmem:[#allocation2 + $0x60] sm:$0xff]  ;;  %v58_v56 = vld [vmem:[#allocation2 + $0x68] sm:$0xff]  ;;  %v59_v58 = vld [vmem:[#allocation2 + $0x70] sm:$0xff] }
  0x38   :  { %261 = vmatprep.subr.bf16.mxu0 %v1781_v9  ;;  %1745 = vmatprep.subr.bf16.mxu1 %v1781_v9  ;;  %v83_v57 = vpack.c.bf16 %v58_v56, %v57_v55  ;;  %v60_v59 = vld [vmem:[#allocation2 + $0x78] sm:$0xff]  ;;  %v61_v60 = vld [vmem:[#allocation2 + $0x80] sm:$0xff]  ;;  %v62_v61 = vld [vmem:[#allocation2 + $0x88] sm:$0xff] }
  0x39   :  { %v84_v62 = vpack.c.bf16 %v60_v59, %v59_v58  ;;  %v85_v63 = vpack.c.bf16 %v62_v61, %v61_v60  ;;  %v63_v1 = vld [vmem:[#allocation2 + $0x90] sm:$0xff]  ;;  %v64_v2 = vld [vmem:[#allocation2 + $0x98] sm:$0xff]  ;;  %v65_v3 = vld [vmem:[#allocation2 + $0xa0] sm:$0xff] }
  0x3a   :  { %v66_v4 = vld [vmem:[#allocation2 + $0xa8] sm:$0xff]  ;;  %v86_v5 = vpack.c.bf16 %v64_v2, %v63_v1  ;;  %v67_v7 = vld [vmem:[#allocation2 + $0xb0] sm:$0xff]  ;;  %v68_v8 = vld [vmem:[#allocation2 + $0xb8] sm:$0xff] }
  0x3b   :  { %262 = vmatpush1.bf16.msra.mxu0 %v1783_v10  ;;  %1753 = vmatpush1.bf16.msra.mxu1 %v1783_v10  ;;  %v87_v6 = vpack.c.bf16 %v66_v4, %v65_v3  ;;  %v88_v9 = vpack.c.bf16 %v68_v8, %v67_v7 }
  0x3c   :  { %263 = vmatprep.subr.bf16.mxu0 %v1784_v11  ;;  %1746 = vmatprep.subr.bf16.mxu1 %v1784_v11 }
  0x3f   :  { %264 = vmatpush1.bf16.msra.mxu0 %v1786_v12  ;;  %1754 = vmatpush1.bf16.msra.mxu1 %v1786_v12 }
  0x40   :  { %265 = vmatprep.subr.bf16.mxu0 %v1787_v13  ;;  %1747 = vmatprep.subr.bf16.mxu1 %v1787_v13 }
  0x43   :  { %266 = vmatpush1.bf16.msra.mxu0 %v1789_v14  ;;  %1755 = vmatpush1.bf16.msra.mxu1 %v1789_v14 }
  0x44   :  { %267 = vmatprep.subr.bf16.mxu0 %v1790_v15  ;;  %1748 = vmatprep.subr.bf16.mxu1 %v1790_v15 }
  0x47   :  { %268 = vmatpush1.bf16.msra.mxu0 %v1792_v16  ;;  %1756 = vmatpush1.bf16.msra.mxu1 %v1792_v16 }
  0x48   :  { %1693 = vmatprep.subr.bf16.mxu1 %v1793_v21 }
  0x4a   :  { %286 = vmatmul.mubr.bf16.vlgmr.msra.gmra.mrb[0].mxu0 %v77_v22  ;;  %406 = vmatmul.mubr.bf16.vlgmr.msra.gmra.mrb[0].mxu1 %v1982_v23 }
  0x4b   :  { %1694 = vmatpush3.bf16.msra.mxu1 %v1793_v21  ;;  %295 = vmatprep.mubr.bf16.mxu0 %v1925_v0 }
  0x4c   :  { %1695 = vmatprep.subr.bf16.mxu1 %v1794_v24  ;;  %415 = vmatprep.mubr.bf16.mxu1 %v1925_v0 }
  0x4f   :  { %1696 = vmatpush3.bf16.msra.mxu1 %v1794_v24 }
  0x50   :  { %1697 = vmatprep.subr.bf16.mxu1 %v1795_v29 }
  0x52   :  { %296 = vmatmul.mubr.bf16.gmra.mrb[4].mxu0 %v78_v30  ;;  %416 = vmatmul.mubr.bf16.gmra.mrb[4].mxu1 %v1987_v31 }
  0x53   :  { %1698 = vmatpush3.bf16.msra.mxu1 %v1795_v29  ;;  %305 = vmatprep.mubr.bf16.mxu0 %v1925_v0 }
  0x54   :  { %1699 = vmatprep.subr.bf16.mxu1 %v1796_v32  ;;  %425 = vmatprep.mubr.bf16.mxu1 %v1925_v0 }
  0x57   :  { %1700 = vmatpush3.bf16.msra.mxu1 %v1796_v32 }
  0x58   :  { %1701 = vmatprep.subr.bf16.mxu1 %v1797_v37 }
  0x5a   :  { %306 = vmatmul.mubr.bf16.gmra.mrb[8].mxu0 %v79_v38  ;;  %426 = vmatmul.mubr.bf16.gmra.mrb[8].mxu1 %v1992_v39 }
  0x5b   :  { %1702 = vmatpush3.bf16.msra.mxu1 %v1797_v37  ;;  %315 = vmatprep.mubr.bf16.mxu0 %v1925_v0 }
  0x5c   :  { %1703 = vmatprep.subr.bf16.mxu1 %v1798_v40  ;;  %435 = vmatprep.mubr.bf16.mxu1 %v1925_v0 }
  0x5f   :  { %1704 = vmatpush3.bf16.msra.mxu1 %v1798_v40 }
  0x60   :  { %1705 = vmatprep.subr.bf16.mxu1 %v1799_v45 }
  0x62   :  { %316 = vmatmul.mubr.bf16.gmra.mrb[12].mxu0 %v80_v46  ;;  %436 = vmatmul.mubr.bf16.gmra.mrb[12].mxu1 %v1997_v47 }
  0x63   :  { %1706 = vmatpush3.bf16.msra.mxu1 %v1799_v45  ;;  %325 = vmatprep.mubr.bf16.mxu0 %v1925_v0 }
  0x64   :  { %1707 = vmatprep.subr.bf16.mxu1 %v1800_v48  ;;  %1709 = vmatprep.mubr.bf16.mxu1 %v77_v22 }
  0x67   :  { %1708 = vmatpush3.bf16.msra.mxu1 %v1800_v48 }
  0x6a   :  { %326 = vmatmul.mubr.bf16.gmra.mrb[16].mxu0 %v81_v51  ;;  %1710 = vmatmul.mubr.bf16.vlgmr.msra.gmra.mrb[16].mxu1 %v78_v30 }
  0x6b   :  { %335 = vmatprep.mubr.bf16.mxu0 %v1925_v0  ;;  %1713 = vmatprep.mubr.bf16.mxu1 %v79_v38 }
  0x72   :  { %336 = vmatmul.mubr.bf16.gmra.mrb[20].mxu0 %v82_v54  ;;  %1714 = vmatmul.mubr.bf16.gmra.mrb[20].mxu1 %v80_v46 }
  0x73   :  { %345 = vmatprep.mubr.bf16.mxu0 %v1925_v0  ;;  %1717 = vmatprep.mubr.bf16.mxu1 %v81_v51 }
  0x7a   :  { %346 = vmatmul.mubr.bf16.gmra.mrb[24].mxu0 %v83_v57  ;;  %1718 = vmatmul.mubr.bf16.gmra.mrb[24].mxu1 %v82_v54 }
  0x7b   :  { %355 = vmatprep.mubr.bf16.mxu0 %v1925_v0  ;;  %1721 = vmatprep.mubr.bf16.mxu1 %v83_v57 }
  0x82   :  { %356 = vmatmul.mubr.bf16.gmra.mrb[28].mxu0 %v84_v62  ;;  %1722 = vmatmul.mubr.bf16.gmra.mrb[28].mxu1 %v84_v62 }
  0x83   :  { %365 = vmatprep.mubr.bf16.mxu0 %v1925_v0  ;;  %1725 = vmatprep.mubr.bf16.mxu1 %v85_v63 }
  0x8a   :  { %366 = vmatmul.mubr.bf16.gmra.mrb[32].mxu0 %v85_v63  ;;  %1726 = vmatmul.mubr.bf16.gmra.mrb[32].mxu1 %v86_v5 }
  0x8b   :  { %375 = vmatprep.mubr.bf16.mxu0 %v1925_v0  ;;  %1729 = vmatprep.mubr.bf16.mxu1 %v87_v6 }
  0x92   :  { %376 = vmatmul.mubr.bf16.gmra.mrb[36].mxu0 %v86_v5  ;;  %1730 = vmatmul.mubr.bf16.gmra.mrb[36].mxu1 %v88_v9 }
  0x93   :  { %385 = vmatprep.mubr.bf16.mxu0 %v1925_v0  ;;  %1733 = vmatprep.mubr.bf16.mxu1 %v1982_v23 }
  0x9a   :  { %386 = vmatmul.mubr.bf16.gmra.mrb[40].mxu0 %v87_v6  ;;  %1734 = vmatmul.mubr.bf16.gmra.mrb[40].mxu1 %v1987_v31 }
  0x9b   :  { %395 = vmatprep.mubr.bf16.mxu0 %v1925_v0  ;;  %1737 = vmatprep.mubr.bf16.mxu1 %v1992_v39 }
  0xa2   :  { %396 = vmatmul.mubr.bf16.gmra.mrb[44].mxu0 %v88_v9  ;;  %1738 = vmatmul.mubr.bf16.gmra.mrb[44].mxu1 %v1997_v47 }
 0x11d   :  { %v287_v10 = vpop.f32.mrb[0].mxu0  ;;  %v407_v11 = vpop.f32.mrb[0].mxu1 }
 0x11e   :  { %v631_v12 = vmul.f32 0.088388346, %v407_v11  ;;  %v289_v13 = vpop.f32.mrb[1].mxu0  ;;  %v409_v14 = vpop.f32.mrb[1].mxu1  ;;  %v607_v15 = vmul.f32 0.088388346, %v287_v10 }
 0x11f   :  { %v291_v16 = vpop.f32.mrb[2].mxu0  ;;  %v411_v17 = vpop.f32.mrb[2].mxu1 }
 0x120   :  { %v608_v18 = vmul.f32 0.088388346, %v291_v16  ;;  %v632_v19 = vmul.f32 0.088388346, %v411_v17  ;;  %v293_v20 = vpop.f32.mrb[3].mxu0  ;;  %v413_v21 = vpop.f32.mrb[3].mxu1 }
 0x121   :  { %v1467_v22 = vpack.c.bf16 %v293_v20, %v289_v13  ;;  %v1527_v23 = vpack.c.bf16 %v413_v21, %v409_v14 }
 0x122   :  { %v1387_v0 = vpack.c.bf16 %v608_v18, %v607_v15  ;;  %v1447_v24 = vpack.c.bf16 %v632_v19, %v631_v12 }
 0x123   :  { %1468 = vst [vmem:[#allocation8] sm:$0xff] %v1467_v22   ;;  %1650 = vst [vmem:[#allocation8 + $0x60] sm:$0xff] %v1527_v23  }
 0x124   :  { %1388 = vst [vmem:[#allocation7] sm:$0xff] %v1387_v0   ;;  %1635 = vst [vmem:[#allocation7 + $0x60] sm:$0xff] %v1447_v24  }
 0x125   :  { %v297_v25 = vpop.f32.mrb[4].mxu0  ;;  %v417_v26 = vpop.f32.mrb[4].mxu1 }
 0x126   :  { %v633_v27 = vmul.f32 0.088388346, %v417_v26  ;;  %v299_v28 = vpop.f32.mrb[5].mxu0  ;;  %v419_v29 = vpop.f32.mrb[5].mxu1  ;;  %v609_v30 = vmul.f32 0.088388346, %v297_v25 }
 0x127   :  { %v301_v31 = vpop.f32.mrb[6].mxu0  ;;  %v421_v32 = vpop.f32.mrb[6].mxu1 }
 0x128   :  { %v610_v33 = vmul.f32 0.088388346, %v301_v31  ;;  %v634_v34 = vmul.f32 0.088388346, %v421_v32  ;;  %v303_v35 = vpop.f32.mrb[7].mxu0  ;;  %v423_v36 = vpop.f32.mrb[7].mxu1 }
 0x129   :  { %v1472_v37 = vpack.c.bf16 %v303_v35, %v299_v28  ;;  %v1532_v38 = vpack.c.bf16 %v423_v36, %v419_v29 }
 0x12a   :  { %v1392_v39 = vpack.c.bf16 %v610_v33, %v609_v30  ;;  %v1452_v40 = vpack.c.bf16 %v634_v34, %v633_v27 }
 0x12b   :  { %1639 = vst [vmem:[#allocation8 + $0x8] sm:$0xff] %v1472_v37   ;;  %1651 = vst [vmem:[#allocation8 + $0x68] sm:$0xff] %v1532_v38  }
 0x12c   :  { %1624 = vst [vmem:[#allocation7 + $0x8] sm:$0xff] %v1392_v39   ;;  %1636 = vst [vmem:[#allocation7 + $0x68] sm:$0xff] %v1452_v40  }
 0x12d   :  { %v307_v41 = vpop.f32.mrb[8].mxu0  ;;  %v427_v42 = vpop.f32.mrb[8].mxu1 }
 0x12e   :  { %v635_v43 = vmul.f32 0.088388346, %v427_v42  ;;  %v309_v44 = vpop.f32.mrb[9].mxu0  ;;  %v429_v45 = vpop.f32.mrb[9].mxu1  ;;  %v611_v46 = vmul.f32 0.088388346, %v307_v41 }
 0x12f   :  { %v311_v47 = vpop.f32.mrb[10].mxu0  ;;  %v431_v48 = vpop.f32.mrb[10].mxu1 }
 0x130   :  { %v612_v49 = vmul.f32 0.088388346, %v311_v47  ;;  %v636_v50 = vmul.f32 0.088388346, %v431_v48  ;;  %v313_v51 = vpop.f32.mrb[11].mxu0  ;;  %v433_v52 = vpop.f32.mrb[11].mxu1 }
 0x131   :  { %v1477_v53 = vpack.c.bf16 %v313_v51, %v309_v44  ;;  %v1537_v54 = vpack.c.bf16 %v433_v52, %v429_v45 }
 0x132   :  { %v1397_v55 = vpack.c.bf16 %v612_v49, %v611_v46  ;;  %v1457_v56 = vpack.c.bf16 %v636_v50, %v635_v43 }
 0x133   :  { %1640 = vst [vmem:[#allocation8 + $0x10] sm:$0xff] %v1477_v53   ;;  %1652 = vst [vmem:[#allocation8 + $0x70] sm:$0xff] %v1537_v54  }
 0x134   :  { %1625 = vst [vmem:[#allocation7 + $0x10] sm:$0xff] %v1397_v55   ;;  %1637 = vst [vmem:[#allocation7 + $0x70] sm:$0xff] %v1457_v56  }
 0x135   :  { %v317_v57 = vpop.f32.mrb[12].mxu0  ;;  %v437_v58 = vpop.f32.mrb[12].mxu1 }
 0x136   :  { %v637_v59 = vmul.f32 0.088388346, %v437_v58  ;;  %v319_v60 = vpop.f32.mrb[13].mxu0  ;;  %v439_v61 = vpop.f32.mrb[13].mxu1  ;;  %v613_v62 = vmul.f32 0.088388346, %v317_v57 }
 0x137   :  { %v321_v63 = vpop.f32.mrb[14].mxu0  ;;  %v441_v1 = vpop.f32.mrb[14].mxu1 }
 0x138   :  { %v614_v2 = vmul.f32 0.088388346, %v321_v63  ;;  %v638_v3 = vmul.f32 0.088388346, %v441_v1  ;;  %v323_v4 = vpop.f32.mrb[15].mxu0  ;;  %v443_v5 = vpop.f32.mrb[15].mxu1 }
 0x139   :  { %v1482_v6 = vpack.c.bf16 %v323_v4, %v319_v60  ;;  %v1542_v7 = vpack.c.bf16 %v443_v5, %v439_v61 }
 0x13a   :  { %v1402_v8 = vpack.c.bf16 %v614_v2, %v613_v62  ;;  %v1462_v9 = vpack.c.bf16 %v638_v3, %v637_v59 }
 0x13b   :  { %1641 = vst [vmem:[#allocation8 + $0x18] sm:$0xff] %v1482_v6   ;;  %1653 = vst [vmem:[#allocation8 + $0x78] sm:$0xff] %v1542_v7  }
 0x13c   :  { %1626 = vst [vmem:[#allocation7 + $0x18] sm:$0xff] %v1402_v8   ;;  %1638 = vst [vmem:[#allocation7 + $0x78] sm:$0xff] %v1462_v9  }
 0x13d   :  { %v327_v10 = vpop.f32.mrb[16].mxu0  ;;  %v1711_v11 = vpop.f32.mrb[16].mxu1 }
 0x13e   :  { %v329_v12 = vpop.f32.mrb[17].mxu0  ;;  %v480_v13 = vpop.f32.mrb[17].mxu1  ;;  %v615_v16 = vmul.f32 0.088388346, %v327_v10 }
 0x13f   :  { %v331_v14 = vpop.f32.mrb[18].mxu0  ;;  %v1712_v15 = vpop.f32.mrb[18].mxu1 }
 0x140   :  { %v616_v17 = vmul.f32 0.088388346, %v331_v14  ;;  %v1552_v18 = vpack.c.bf16 %v1712_v15, %v1711_v11  ;;  %v333_v19 = vpop.f32.mrb[19].mxu0  ;;  %v483_v20 = vpop.f32.mrb[19].mxu1 }
 0x141   :  { %v1487_v21 = vpack.c.bf16 %v333_v19, %v329_v12  ;;  %v1547_v22 = vpack.c.bf16 %v483_v20, %v480_v13 }
 0x142   :  { %v1407_v23 = vpack.c.bf16 %v616_v17, %v615_v16  ;;  %1654 = vst [vmem:[#allocation10 + $0x8] sm:$0xff] %v1552_v18  }
 0x143   :  { %1642 = vst [vmem:[#allocation8 + $0x20] sm:$0xff] %v1487_v21   ;;  %1548 = vst [vmem:[#allocation10] sm:$0xff] %v1547_v22  }
 0x144   :  { %1627 = vst [vmem:[#allocation7 + $0x20] sm:$0xff] %v1407_v23  }
 0x145   :  { %v337_v0 = vpop.f32.mrb[20].mxu0  ;;  %v1715_v24 = vpop.f32.mrb[20].mxu1 }
 0x146   :  { %v339_v25 = vpop.f32.mrb[21].mxu0  ;;  %v496_v26 = vpop.f32.mrb[21].mxu1  ;;  %v617_v29 = vmul.f32 0.088388346, %v337_v0 }
 0x147   :  { %v341_v27 = vpop.f32.mrb[22].mxu0  ;;  %v1716_v28 = vpop.f32.mrb[22].mxu1 }
 0x148   :  { %v618_v30 = vmul.f32 0.088388346, %v341_v27  ;;  %v1562_v31 = vpack.c.bf16 %v1716_v28, %v1715_v24  ;;  %v343_v32 = vpop.f32.mrb[23].mxu0  ;;  %v499_v33 = vpop.f32.mrb[23].mxu1 }
 0x149   :  { %v1492_v34 = vpack.c.bf16 %v343_v32, %v339_v25  ;;  %v1557_v35 = vpack.c.bf16 %v499_v33, %v496_v26 }
 0x14a   :  { %v1412_v36 = vpack.c.bf16 %v618_v30, %v617_v29  ;;  %1656 = vst [vmem:[#allocation10 + $0x18] sm:$0xff] %v1562_v31  }
 0x14b   :  { %1643 = vst [vmem:[#allocation8 + $0x28] sm:$0xff] %v1492_v34   ;;  %1655 = vst [vmem:[#allocation10 + $0x10] sm:$0xff] %v1557_v35  }
 0x14c   :  { %1628 = vst [vmem:[#allocation7 + $0x28] sm:$0xff] %v1412_v36  }
 0x14d   :  { %v347_v37 = vpop.f32.mrb[24].mxu0  ;;  %v1719_v38 = vpop.f32.mrb[24].mxu1 }
 0x14e   :  { %v349_v39 = vpop.f32.mrb[25].mxu0  ;;  %v512_v40 = vpop.f32.mrb[25].mxu1  ;;  %v619_v43 = vmul.f32 0.088388346, %v347_v37 }
 0x14f   :  { %v351_v41 = vpop.f32.mrb[26].mxu0  ;;  %v1720_v42 = vpop.f32.mrb[26].mxu1 }
 0x150   :  { %v620_v44 = vmul.f32 0.088388346, %v351_v41  ;;  %v1572_v45 = vpack.c.bf16 %v1720_v42, %v1719_v38  ;;  %v353_v46 = vpop.f32.mrb[27].mxu0  ;;  %v515_v47 = vpop.f32.mrb[27].mxu1 }
 0x151   :  { %v1497_v48 = vpack.c.bf16 %v353_v46, %v349_v39  ;;  %v1567_v49 = vpack.c.bf16 %v515_v47, %v512_v40 }
 0x152   :  { %v1417_v50 = vpack.c.bf16 %v620_v44, %v619_v43  ;;  %1658 = vst [vmem:[#allocation10 + $0x28] sm:$0xff] %v1572_v45  }
 0x153   :  { %1644 = vst [vmem:[#allocation8 + $0x30] sm:$0xff] %v1497_v48   ;;  %1657 = vst [vmem:[#allocation10 + $0x20] sm:$0xff] %v1567_v49  }
 0x154   :  { %1629 = vst [vmem:[#allocation7 + $0x30] sm:$0xff] %v1417_v50  }
 0x155   :  { %v357_v51 = vpop.f32.mrb[28].mxu0  ;;  %v1723_v52 = vpop.f32.mrb[28].mxu1 }
 0x156   :  { %v359_v53 = vpop.f32.mrb[29].mxu0  ;;  %v528_v54 = vpop.f32.mrb[29].mxu1  ;;  %v621_v57 = vmul.f32 0.088388346, %v357_v51 }
 0x157   :  { %v361_v55 = vpop.f32.mrb[30].mxu0  ;;  %v1724_v56 = vpop.f32.mrb[30].mxu1 }
 0x158   :  { %v622_v58 = vmul.f32 0.088388346, %v361_v55  ;;  %v1582_v59 = vpack.c.bf16 %v1724_v56, %v1723_v52  ;;  %v363_v60 = vpop.f32.mrb[31].mxu0  ;;  %v531_v61 = vpop.f32.mrb[31].mxu1 }
 0x159   :  { %v1502_v62 = vpack.c.bf16 %v363_v60, %v359_v53  ;;  %v1577_v63 = vpack.c.bf16 %v531_v61, %v528_v54 }
 0x15a   :  { %v1422_v1 = vpack.c.bf16 %v622_v58, %v621_v57  ;;  %1660 = vst [vmem:[#allocation10 + $0x38] sm:$0xff] %v1582_v59  }
 0x15b   :  { %1645 = vst [vmem:[#allocation8 + $0x38] sm:$0xff] %v1502_v62   ;;  %1659 = vst [vmem:[#allocation10 + $0x30] sm:$0xff] %v1577_v63  }
 0x15c   :  { %1630 = vst [vmem:[#allocation7 + $0x38] sm:$0xff] %v1422_v1  }
 0x15d   :  { %v367_v2 = vpop.f32.mrb[32].mxu0  ;;  %v1727_v3 = vpop.f32.mrb[32].mxu1 }
 0x15e   :  { %v369_v4 = vpop.f32.mrb[33].mxu0  ;;  %v544_v5 = vpop.f32.mrb[33].mxu1  ;;  %v623_v8 = vmul.f32 0.088388346, %v367_v2 }
 0x15f   :  { %v371_v6 = vpop.f32.mrb[34].mxu0  ;;  %v1728_v7 = vpop.f32.mrb[34].mxu1 }
 0x160   :  { %v624_v9 = vmul.f32 0.088388346, %v371_v6  ;;  %v1592_v10 = vpack.c.bf16 %v1728_v7, %v1727_v3  ;;  %v373_v11 = vpop.f32.mrb[35].mxu0  ;;  %v547_v12 = vpop.f32.mrb[35].mxu1 }
 0x161   :  { %v1507_v13 = vpack.c.bf16 %v373_v11, %v369_v4  ;;  %v1587_v14 = vpack.c.bf16 %v547_v12, %v544_v5 }
 0x162   :  { %v1427_v15 = vpack.c.bf16 %v624_v9, %v623_v8  ;;  %1662 = vst [vmem:[#allocation10 + $0x48] sm:$0xff] %v1592_v10  }
 0x163   :  { %1646 = vst [vmem:[#allocation8 + $0x40] sm:$0xff] %v1507_v13   ;;  %1661 = vst [vmem:[#allocation10 + $0x40] sm:$0xff] %v1587_v14  }
 0x164   :  { %1631 = vst [vmem:[#allocation7 + $0x40] sm:$0xff] %v1427_v15  }
 0x165   :  { %v377_v16 = vpop.f32.mrb[36].mxu0  ;;  %v1731_v17 = vpop.f32.mrb[36].mxu1 }
 0x166   :  { %v379_v18 = vpop.f32.mrb[37].mxu0  ;;  %v560_v19 = vpop.f32.mrb[37].mxu1  ;;  %v625_v22 = vmul.f32 0.088388346, %v377_v16 }
 0x167   :  { %v381_v20 = vpop.f32.mrb[38].mxu0  ;;  %v1732_v21 = vpop.f32.mrb[38].mxu1 }
 0x168   :  { %v626_v23 = vmul.f32 0.088388346, %v381_v20  ;;  %v1602_v0 = vpack.c.bf16 %v1732_v21, %v1731_v17  ;;  %v383_v24 = vpop.f32.mrb[39].mxu0  ;;  %v563_v25 = vpop.f32.mrb[39].mxu1 }
 0x169   :  { %v1512_v26 = vpack.c.bf16 %v383_v24, %v379_v18  ;;  %v1597_v27 = vpack.c.bf16 %v563_v25, %v560_v19 }
 0x16a   :  { %v1432_v28 = vpack.c.bf16 %v626_v23, %v625_v22  ;;  %1664 = vst [vmem:[#allocation10 + $0x58] sm:$0xff] %v1602_v0  }
 0x16b   :  { %1647 = vst [vmem:[#allocation8 + $0x48] sm:$0xff] %v1512_v26   ;;  %1663 = vst [vmem:[#allocation10 + $0x50] sm:$0xff] %v1597_v27  }
 0x16c   :  { %1632 = vst [vmem:[#allocation7 + $0x48] sm:$0xff] %v1432_v28  }
 0x16d   :  { %v387_v29 = vpop.f32.mrb[40].mxu0  ;;  %v1735_v30 = vpop.f32.mrb[40].mxu1 }
 0x16e   :  { %v389_v31 = vpop.f32.mrb[41].mxu0  ;;  %v576_v32 = vpop.f32.mrb[41].mxu1  ;;  %v627_v35 = vmul.f32 0.088388346, %v387_v29 }
 0x16f   :  { %v391_v33 = vpop.f32.mrb[42].mxu0  ;;  %v1736_v34 = vpop.f32.mrb[42].mxu1 }
 0x170   :  { %v628_v36 = vmul.f32 0.088388346, %v391_v33  ;;  %v1612_v37 = vpack.c.bf16 %v1736_v34, %v1735_v30  ;;  %v393_v38 = vpop.f32.mrb[43].mxu0  ;;  %v579_v39 = vpop.f32.mrb[43].mxu1 }
 0x171   :  { %v1517_v40 = vpack.c.bf16 %v393_v38, %v389_v31  ;;  %v1607_v41 = vpack.c.bf16 %v579_v39, %v576_v32 }
 0x172   :  { %v1437_v42 = vpack.c.bf16 %v628_v36, %v627_v35  ;;  %1666 = vst [vmem:[#allocation10 + $0x68] sm:$0xff] %v1612_v37  }
 0x173   :  { %1648 = vst [vmem:[#allocation8 + $0x50] sm:$0xff] %v1517_v40   ;;  %1665 = vst [vmem:[#allocation10 + $0x60] sm:$0xff] %v1607_v41  }
 0x174   :  { %1633 = vst [vmem:[#allocation7 + $0x50] sm:$0xff] %v1437_v42  }
 0x175   :  { %v397_v43 = vpop.f32.mrb[44].mxu0  ;;  %v1739_v44 = vpop.f32.mrb[44].mxu1 }
 0x176   :  { %v399_v45 = vpop.f32.mrb[45].mxu0  ;;  %v592_v46 = vpop.f32.mrb[45].mxu1  ;;  %v629_v49 = vmul.f32 0.088388346, %v397_v43 }
 0x177   :  { %v401_v47 = vpop.f32.mrb[46].mxu0  ;;  %v1740_v48 = vpop.f32.mrb[46].mxu1 }
 0x178   :  { %v630_v50 = vmul.f32 0.088388346, %v401_v47  ;;  %v1622_v51 = vpack.c.bf16 %v1740_v48, %v1739_v44  ;;  %v403_v52 = vpop.f32.mrb[47].mxu0  ;;  %v595_v53 = vpop.f32.mrb[47].mxu1 }
 0x179   :  { %v1522_v54 = vpack.c.bf16 %v403_v52, %v399_v45  ;;  %v1617_v55 = vpack.c.bf16 %v595_v53, %v592_v46 }
 0x17a   :  { %v1442_v56 = vpack.c.bf16 %v630_v50, %v629_v49  ;;  %1668 = vst [vmem:[#allocation10 + $0x78] sm:$0xff] %v1622_v51  }
 0x17b   :  { %1649 = vst [vmem:[#allocation8 + $0x58] sm:$0xff] %v1522_v54   ;;  %1667 = vst [vmem:[#allocation10 + $0x70] sm:$0xff] %v1617_v55  }
 0x17c   :  { %1634 = vst [vmem:[#allocation7 + $0x58] sm:$0xff] %v1442_v56  }
 0x17d   :  { %1856 = shalt.err (!%p1853_p6)
}
 0x17e   :  { %s1857_s24 = scalar_lea.hbm %s2074_s3, 2048 }
 0x17f   :  { %p1858_p7 = scmp.ne.s32.totalorder %s2074_s3, %s1857_s24  ;;  %p1861_p8 = scmp.lt.u32.totalorder %s1857_s24, %s2074_s3 }
 0x181   :  { %p1863_p9 = pnand %p1861_p8, %p1858_p7 }
 0x183   :  { %1866 = shalt.err (!%p1863_p9)
}
 0x184   :  { %s1929_s29 = smov 64   ;;  %s1930_s30 = smov 4  }
 0x185   :  { %1142 = dma.vmem_to_hbm [thread:$0]  %s1137_s16, 2048, %s2074_s3, [#allocation9], %s1929_s29, %s1929_s29, %s1930_s30  }
 0x186   :  { %s1867_s7 = scalar_lea.vmem %s2012_s18, 2048  ;;  %p1872_p11 = scmp.lt.s32.totalorder %s2012_s18, %s2012_s18 }
 0x187   :  { %p1868_p10 = scmp.ne.s32.totalorder %s2012_s18, %s1867_s7  ;;  %p1873_p12 = scmp.lt.s32.totalorder %s1867_s7, %s1867_s7 }
 0x189   :  { %p1874_p13 = por %p1873_p12, %p1872_p11 }
 0x18b   :  { %p1875_p0 = pnand %p1874_p13, %p1868_p10 }
 0x18d   :  { %1878 = shalt.err (!%p1875_p0)
}
 0x18e   :  { %s1879_s10 = scalar_lea.hbm %s2073_s2, 2048 }
 0x18f   :  { %p1880_p1 = scmp.ne.s32.totalorder %s2073_s2, %s1879_s10  ;;  %p1883_p2 = scmp.lt.u32.totalorder %s1879_s10, %s2073_s2 }
 0x191   :  { %p1885_p3 = pnand %p1883_p2, %p1880_p1 }
 0x193   :  { %1888 = shalt.err (!%p1885_p3)
}
 0x194   :  { %1130 = dma.vmem_to_hbm [thread:$0]  %s2012_s18, 2048, %s2073_s2, [#allocation4], %s1929_s29, %s1929_s29, %s1930_s30  }
 0x195   :  { %s1889_s15 = scalar_lea.vmem %s2014_s20, 2048  ;;  %p1894_p5 = scmp.lt.s32.totalorder %s2014_s20, %s2014_s20 }
 0x196   :  { %p1890_p4 = scmp.ne.s32.totalorder %s2014_s20, %s1889_s15  ;;  %p1895_p6 = scmp.lt.s32.totalorder %s1889_s15, %s1889_s15 }
 0x198   :  { %p1896_p7 = por %p1895_p6, %p1894_p5 }
 0x19a   :  { %p1897_p8 = pnand %p1896_p7, %p1890_p4 }
 0x19c   :  { %1900 = shalt.err (!%p1897_p8)
}
 0x19d   :  { %s1901_s17 = scalar_lea.hbm %s2075_s4, 2048 }
 0x19e   :  { %p1902_p9 = scmp.ne.s32.totalorder %s2075_s4, %s1901_s17  ;;  %p1905_p10 = scmp.lt.u32.totalorder %s1901_s17, %s2075_s4 }
 0x1a0   :  { %p1907_p11 = pnand %p1905_p10, %p1902_p9 }
 0x1a2   :  { %1910 = shalt.err (!%p1907_p11)
}
 0x1a3   :  { %1154 = dma.vmem_to_hbm [thread:$0]  %s2014_s20, 2048, %s2075_s4, [#allocation9], %s1929_s29, %s1929_s29, %s1930_s30  }
 0x1a4   :  { %1915 = dma.done.wait [#allocation4], 2048  }
 0x1a5   :  { %1916 = vsyncadd [#allocation4], 4294965248 }
 0x1a6   :  { %1917 = dma.done.wait [#allocation9], 4096  }
 0x1a7   :  { %1918 = vsyncadd [#allocation9], 4294963200 }
 0x1a8   :  { %1164 = vsyncpa [#allocation3], 1 }
 0x1a9   :  { %1165 = vsyncpa [#allocation6], 1 }
 0x1aa   :  { %1166 = vsyncpa [#allocation4], 1 }
 0x1ab   :  { %1167 = vsyncpa [#allocation9], 1 }

</bundles_post_ra>
